<compile_context>
chip_gen: v5e
topology: v5e:2x2
jax: 0.10.0
libtpu: 0.0.40
codegen_flags: <defaults>
</compile_context>

<pallas_src>
import functools

import jax
import jax.numpy as jnp
from jax.experimental import pallas as pl
from jax.experimental.pallas import tpu as pltpu

H1 = 128      # first hidden width
H2 = 64       # second hidden width (logical)
H2_PAD = 128  # lane-dense padded width of the middle layer


def _round_up(x, m):
    return ((x + m - 1) // m) * m


# --------------------------------------------------------------------------- #
# Kernel
# --------------------------------------------------------------------------- #
def _qnet_kernel(x_ref, w1_ref, b1_ref, w2_ref, b2_ref, w3_ref, b3_ref, o_ref):
    # x_ref : [TB, d_in_pad]          w1_ref: [d_in_pad, 128]   b1_ref: [1, 128]
    # w2_ref: [128, 128]              b2_ref: [1, 128]
    # w3_ref: [128, n_pad]            b3_ref: [1, n_pad]        o_ref : [TB, n_pad]
    # Matmuls run in the weights' dtype (f32 or bf16) with f32 accumulation;
    # bias add + ReLU stay f32 (v5e VPU has no bf16).
    x = x_ref[...]

    h1 = jnp.dot(x, w1_ref[...], preferred_element_type=jnp.float32) + b1_ref[...]
    h1 = jnp.maximum(h1, 0.0).astype(w2_ref.dtype)

    h2 = jnp.dot(h1, w2_ref[...], preferred_element_type=jnp.float32) + b2_ref[...]
    h2 = jnp.maximum(h2, 0.0).astype(w3_ref.dtype)

    out = jnp.dot(h2, w3_ref[...], preferred_element_type=jnp.float32) + b3_ref[...]
    o_ref[...] = out.astype(o_ref.dtype)


# --------------------------------------------------------------------------- #
# One-time parameter padding (hoisted out of the per-call path)
# --------------------------------------------------------------------------- #
def pad_params(params, compute_dtype=jnp.float32):
    """Pad params to TPU-friendly shapes once (at init / after each update).

    Zero padding is numerically exact: padded input columns multiply zero
    weight rows, ReLU of the zero middle columns is 0, and zero rows of w3
    contribute nothing.  Weights are stored (in_features, out_features).
    """
    w1, b1, w2, b2, w3, b3 = params
    d_in = w1.shape[0]
    d_out = w3.shape[1]
    d_in_pad = _round_up(max(d_in, 128), 128)
    n_pad = _round_up(max(d_out, 128), 128)

    w1_p = jnp.zeros((d_in_pad, H1), compute_dtype).at[:d_in, :].set(
        w1.astype(compute_dtype))
    b1_p = b1.reshape(1, H1).astype(jnp.float32)

    w2_p = jnp.zeros((H1, H2_PAD), compute_dtype).at[:, :H2].set(
        w2.astype(compute_dtype))
    b2_p = jnp.zeros((1, H2_PAD), jnp.float32).at[0, :H2].set(
        b2.astype(jnp.float32))

    w3_p = jnp.zeros((H2_PAD, n_pad), compute_dtype).at[:H2, :d_out].set(
        w3.astype(compute_dtype))
    b3_p = jnp.zeros((1, n_pad), jnp.float32).at[0, :d_out].set(
        b3.astype(jnp.float32))

    return (w1_p, b1_p, w2_p, b2_p, w3_p, b3_p)


# --------------------------------------------------------------------------- #
# Batch-tile selection with VMEM guard (v7x-safe) and >=2-step grid
# --------------------------------------------------------------------------- #
def _choose_batch_tile(B, d_in_pad, n_pad, x_itemsize, weight_bytes):
    b8 = _round_up(max(B, 1), 8)

    # Keep double-buffered x/out tiles + (double-buffered) resident weights
    # comfortably under the 32 MiB scoped VMEM limit (works on v7x's 64 MiB).
    budget = (26 << 20) - weight_bytes
    per_row = 2 * (d_in_pad * x_itemsize + n_pad * 4)   # 2x buffers; out is f32
    max_tb = max(8, (budget // per_row) // 8 * 8)
    # TODO(synk): for very large d_in (e.g. 4x84x84 frames in f32) the resident
    # w1 alone approaches the scoped limit; add a K grid axis ("arbitrary",
    # last) with an f32 accumulator scratch instead of shrinking tb further.

    tb = min(1024, b8, max_tb)
    tb = max(8, (tb // 8) * 8)

    # v7x megacore: make sure there are >=2 grid steps when the batch is big
    # enough to matter, so both TensorCores get work.
    if b8 > 256 and b8 <= tb:
        tb = max(8, _round_up((b8 + 1) // 2, 8))

    b_pad = _round_up(b8, tb)
    return tb, b_pad


# --------------------------------------------------------------------------- #
# Jitted forward on pre-padded params
# --------------------------------------------------------------------------- #
@functools.partial(jax.jit, static_argnames=("d_out",))
def qnetwork_apply(x, padded_params, *, d_out):
    """x: [B, ...] (flattened to [B, d_in]). Returns [B, d_out] float32."""
    w1_p, b1_p, w2_p, b2_p, w3_p, b3_p = padded_params
    compute_dtype = w1_p.dtype

    B = x.shape[0]
    x_flat = x.reshape(B, -1).astype(compute_dtype)    # nn.Flatten()
    d_in = x_flat.shape[1]
    d_in_pad = w1_p.shape[0]
    n_pad = w3_p.shape[1]
    assert d_in <= d_in_pad and d_out <= n_pad

    x_itemsize = jnp.dtype(compute_dtype).itemsize
    weight_bytes = 2 * (
        (w1_p.size + w2_p.size + w3_p.size) * x_itemsize
        + (b1_p.size + b2_p.size + b3_p.size) * 4
    )
    tb, b_pad = _choose_batch_tile(B, d_in_pad, n_pad, x_itemsize, weight_bytes)

    # Remainder-only padding of x (skipped entirely when already aligned).
    if (b_pad, d_in_pad) != x_flat.shape:
        x_flat = jnp.pad(x_flat, ((0, b_pad - B), (0, d_in_pad - d_in)))

    grid = (b_pad // tb,)

    # Weights/biases: block index is always (0, 0) -> they stay VMEM-resident
    # across grid steps (only the x / out tiles stream through the pipeline).
    resident = lambda shape: pl.BlockSpec(shape, lambda i: (0, 0))

    out_p = pl.pallas_call(
        _qnet_kernel,
        out_shape=jax.ShapeDtypeStruct((b_pad, n_pad), jnp.float32),
        grid=grid,
        in_specs=[
            pl.BlockSpec((tb, d_in_pad), lambda i: (i, 0)),   # x tile (pipelined)
            resident((d_in_pad, H1)),
            resident((1, H1)),
            resident((H1, H2_PAD)),
            resident((1, H2_PAD)),
            resident((H2_PAD, n_pad)),
            resident((1, n_pad)),
        ],
        out_specs=pl.BlockSpec((tb, n_pad), lambda i: (i, 0)),
        compiler_params=pltpu.CompilerParams(
            dimension_semantics=("parallel",),   # batch rows independent -> 2 TCs
            vmem_limit_bytes=32 << 20,
        ),
    )(x_flat, w1_p, b1_p, w2_p, b2_p, w3_p, b3_p)

    return out_p[:B, :d_out]


def qnetwork_forward(x, params, compute_dtype=jnp.float32):
    """One-shot convenience (pads params every call).  For repeated calls,
    pad once with pad_params() and call qnetwork_apply() directly."""
    padded = pad_params(params, compute_dtype)
    return qnetwork_apply(x, padded, d_out=params[4].shape[1])


# --------------------------------------------------------------------------- #
# Init + pure-JAX reference
# --------------------------------------------------------------------------- #
def init_params(key, input_dim, output_dim):
    """nn.Linear-style init U(-1/sqrt(fan_in), 1/sqrt(fan_in)); weights stored
    as (in_features, out_features), i.e. PyTorch W.T."""
    def linear(key, fan_in, fan_out):
        kw, kb = jax.random.split(key)
        bound = 1.0 / jnp.sqrt(fan_in)
        w = jax.random.uniform(kw, (fan_in, fan_out), jnp.float32, -bound, bound)
        b = jax.random.uniform(kb, (fan_out,), jnp.float32, -bound, bound)
        return w, b

    k1, k2, k3 = jax.random.split(key, 3)
    w1, b1 = linear(k1, input_dim, H1)
    w2, b2 = linear(k2, H1, H2)
    w3, b3 = linear(k3, H2, output_dim)
    return (w1, b1, w2, b2, w3, b3)


def _reference_forward(x, params):
    """Pure-JAX reference matching the PyTorch forward exactly."""
    w1, b1, w2, b2, w3, b3 = params
    h = x.reshape(x.shape[0], -1)
    h = jnp.maximum(h @ w1 + b1, 0.0)
    h = jnp.maximum(h @ w2 + b2, 0.0)
    return h @ w3 + b3


if __name__ == "__main__":
    key = jax.random.PRNGKey(0)
    kx, kp = jax.random.split(key)

    # Small shapes: batch=2, state frames C=4, spatial 16x16 -> input_dim=1024,
    # output_dim=7 (Mario action space size).
    B, C, Hs, Ws = 2, 4, 16, 16
    input_dim = C * Hs * Ws
    output_dim = 7

    x = jax.random.normal(kx, (B, C, Hs, Ws), dtype=jnp.float32)
    params = init_params(kp, input_dim, output_dim)
    ref = _reference_forward(x, params)

    # f32 path (bit-tracks the PyTorch numerics).
    padded_f32 = pad_params(params)                      # once, at init time
    out = qnetwork_apply(x, padded_f32, d_out=output_dim)
    out = jax.block_until_ready(out)
    assert out.shape == (B, output_dim)
    assert jnp.allclose(out, ref, atol=1e-4, rtol=1e-4), "f32 mismatch vs reference"

    # bf16 MXU path (v6e/v7x HBM-traffic win) — looser tolerance vs f32 ref.
    padded_bf16 = pad_params(params, compute_dtype=jnp.bfloat16)
    out_bf16 = jax.block_until_ready(
        qnetwork_apply(x, padded_bf16, d_out=output_dim))
    assert jnp.allclose(out_bf16, ref, atol=5e-2, rtol=5e-2), "bf16 mismatch"

    print("KERNEL_OK")
</pallas_src>

<mosaic_0001>
module attributes {stable_mosaic.version = 11 : i64} {
  func.func @_qnet_kernel(%arg0: i32, %arg1: memref<8x1024xf32, #tpu.memory_space<vmem>>, %arg2: memref<1024x128xf32, #tpu.memory_space<vmem>>, %arg3: memref<1x128xf32, #tpu.memory_space<vmem>>, %arg4: memref<128x128xf32, #tpu.memory_space<vmem>>, %arg5: memref<1x128xf32, #tpu.memory_space<vmem>>, %arg6: memref<128x128xf32, #tpu.memory_space<vmem>>, %arg7: memref<1x128xf32, #tpu.memory_space<vmem>>, %arg8: memref<8x128xf32, #tpu.memory_space<vmem>>) attributes {dimension_semantics = [#tpu.dimension_semantics<parallel>], iteration_bounds = array<i64: 1>, scalar_prefetch = 0 : i64, scratch_operands = 0 : i64, tpu.core_type = #tpu.core_type<tc>, window_params = [{transform_indices = @transform_0, window_bounds = array<i64: 8, 1024>}, {pipeline_mode = #tpu.pipeline_mode<synchronous>, transform_indices = @transform_1, window_bounds = array<i64: 1024, 128>}, {pipeline_mode = #tpu.pipeline_mode<synchronous>, transform_indices = @transform_2, window_bounds = array<i64: 1, 128>}, {pipeline_mode = #tpu.pipeline_mode<synchronous>, transform_indices = @transform_3, window_bounds = array<i64: 128, 128>}, {pipeline_mode = #tpu.pipeline_mode<synchronous>, transform_indices = @transform_4, window_bounds = array<i64: 1, 128>}, {pipeline_mode = #tpu.pipeline_mode<synchronous>, transform_indices = @transform_5, window_bounds = array<i64: 128, 128>}, {pipeline_mode = #tpu.pipeline_mode<synchronous>, transform_indices = @transform_6, window_bounds = array<i64: 1, 128>}, {transform_indices = @transform_7, window_bounds = array<i64: 8, 128>}]} {
    %c0 = arith.constant 0 : index
    %c0_0 = arith.constant 0 : index
    %0 = vector.load %arg1[%c0, %c0_0] : memref<8x1024xf32, #tpu.memory_space<vmem>>, vector<8x1024xf32>
    %c0_1 = arith.constant 0 : index
    %c0_2 = arith.constant 0 : index
    %1 = vector.load %arg2[%c0_1, %c0_2] : memref<1024x128xf32, #tpu.memory_space<vmem>>, vector<1024x128xf32>
    %cst = arith.constant dense<0.000000e+00> : vector<8x128xf32>
    %2 = tpu.matmul %0, %1, %cst {dimension_numbers = #tpu.dot_dimension_numbers<[1], [0], [0], [1], [0, 0, 1, 1], [], []>} : vector<8x1024xf32>, vector<1024x128xf32>, vector<8x128xf32> -> vector<8x128xf32>
    %c0_3 = arith.constant 0 : index
    %c0_4 = arith.constant 0 : index
    %3 = vector.load %arg3[%c0_3, %c0_4] : memref<1x128xf32, #tpu.memory_space<vmem>>, vector<1x128xf32>
    %4 = vector.broadcast %3 : vector<1x128xf32> to vector<8x128xf32>
    %5 = arith.addf %2, %4 : vector<8x128xf32>
    %cst_5 = arith.constant 0.000000e+00 : f32
    %6 = vector.broadcast %cst_5 : f32 to vector<8x128xf32>
    %7 = arith.maximumf %5, %6 : vector<8x128xf32>
    %c0_6 = arith.constant 0 : index
    %c0_7 = arith.constant 0 : index
    %8 = vector.load %arg4[%c0_6, %c0_7] : memref<128x128xf32, #tpu.memory_space<vmem>>, vector<128x128xf32>
    %cst_8 = arith.constant dense<0.000000e+00> : vector<8x128xf32>
    %9 = tpu.matmul %7, %8, %cst_8 {dimension_numbers = #tpu.dot_dimension_numbers<[1], [0], [0], [1], [0, 0, 1, 1], [], []>} : vector<8x128xf32>, vector<128x128xf32>, vector<8x128xf32> -> vector<8x128xf32>
    %c0_9 = arith.constant 0 : index
    %c0_10 = arith.constant 0 : index
    %10 = vector.load %arg5[%c0_9, %c0_10] : memref<1x128xf32, #tpu.memory_space<vmem>>, vector<1x128xf32>
    %11 = vector.broadcast %10 : vector<1x128xf32> to vector<8x128xf32>
    %12 = arith.addf %9, %11 : vector<8x128xf32>
    %cst_11 = arith.constant 0.000000e+00 : f32
    %13 = vector.broadcast %cst_11 : f32 to vector<8x128xf32>
    %14 = arith.maximumf %12, %13 : vector<8x128xf32>
    %c0_12 = arith.constant 0 : index
    %c0_13 = arith.constant 0 : index
    %15 = vector.load %arg6[%c0_12, %c0_13] : memref<128x128xf32, #tpu.memory_space<vmem>>, vector<128x128xf32>
    %cst_14 = arith.constant dense<0.000000e+00> : vector<8x128xf32>
    %16 = tpu.matmul %14, %15, %cst_14 {dimension_numbers = #tpu.dot_dimension_numbers<[1], [0], [0], [1], [0, 0, 1, 1], [], []>} : vector<8x128xf32>, vector<128x128xf32>, vector<8x128xf32> -> vector<8x128xf32>
    %c0_15 = arith.constant 0 : index
    %c0_16 = arith.constant 0 : index
    %17 = vector.load %arg7[%c0_15, %c0_16] : memref<1x128xf32, #tpu.memory_space<vmem>>, vector<1x128xf32>
    %18 = vector.broadcast %17 : vector<1x128xf32> to vector<8x128xf32>
    %19 = arith.addf %16, %18 : vector<8x128xf32>
    %c0_17 = arith.constant 0 : index
    %c0_18 = arith.constant 0 : index
    %20 = vector.load %arg8[%c0_17, %c0_18] : memref<8x128xf32, #tpu.memory_space<vmem>>, vector<8x128xf32>
    tpu.vector_store %arg8[%c0_17, %c0_18], %19 {strides = array<i32>} : memref<8x128xf32, #tpu.memory_space<vmem>>, vector<8x128xf32>,
    return
  }
  func.func @transform_0(%arg0: i32) -> (i32, i32) {
    %c0_i32 = arith.constant 0 : i32
    %c0_i32_0 = arith.constant 0 : i32
    return %arg0, %c0_i32 : i32, i32
  }
  func.func @transform_1(%arg0: i32) -> (i32, i32) {
    %c0_i32 = arith.constant 0 : i32
    %c0_i32_0 = arith.constant 0 : i32
    %c0_i32_1 = arith.constant 0 : i32
    return %c0_i32, %c0_i32_0 : i32, i32
  }
  func.func @transform_2(%arg0: i32) -> (i32, i32) {
    %c0_i32 = arith.constant 0 : i32
    %c0_i32_0 = arith.constant 0 : i32
    %c0_i32_1 = arith.constant 0 : i32
    return %c0_i32, %c0_i32_0 : i32, i32
  }
  func.func @transform_3(%arg0: i32) -> (i32, i32) {
    %c0_i32 = arith.constant 0 : i32
    %c0_i32_0 = arith.constant 0 : i32
    %c0_i32_1 = arith.constant 0 : i32
    return %c0_i32, %c0_i32_0 : i32, i32
  }
  func.func @transform_4(%arg0: i32) -> (i32, i32) {
    %c0_i32 = arith.constant 0 : i32
    %c0_i32_0 = arith.constant 0 : i32
    %c0_i32_1 = arith.constant 0 : i32
    return %c0_i32, %c0_i32_0 : i32, i32
  }
  func.func @transform_5(%arg0: i32) -> (i32, i32) {
    %c0_i32 = arith.constant 0 : i32
    %c0_i32_0 = arith.constant 0 : i32
    %c0_i32_1 = arith.constant 0 : i32
    return %c0_i32, %c0_i32_0 : i32, i32
  }
  func.func @transform_6(%arg0: i32) -> (i32, i32) {
    %c0_i32 = arith.constant 0 : i32
    %c0_i32_0 = arith.constant 0 : i32
    %c0_i32_1 = arith.constant 0 : i32
    return %c0_i32, %c0_i32_0 : i32, i32
  }
  func.func @transform_7(%arg0: i32) -> (i32, i32) {
    %c0_i32 = arith.constant 0 : i32
    %c0_i32_0 = arith.constant 0 : i32
    return %arg0, %c0_i32 : i32, i32
  }
}

</mosaic_0001>

<bundles_post_ra>
// kernel: qnetwork_apply.1
= control target key start
LH: loop header
LB: loop body
LE: loop exit
PB: predicated region body
PF: predicated region fallthrough
CT: control target
= control target key end

     0   :  { %12 = vsyncpa [#allocation3], 0  ;;  %s640_s0 = inlined_call_operand.vmem [shape: f32[8,1024], index: 0, kind: input, shape index: {}]   ;;  %s641_s1 = inlined_call_operand.hbm [shape: f32[1024,128], index: 1, kind: input, shape index: {}]   ;;  %s642_s2 = inlined_call_operand.vmem [shape: f32[1,128], index: 2, kind: input, shape index: {}]   ;;  %s643_s3 = inlined_call_operand.vmem [shape: f32[128,128], index: 3, kind: input, shape index: {}]   ;;  %s644_s4 = inlined_call_operand.vmem [shape: f32[1,128], index: 4, kind: input, shape index: {}]   ;;  %s645_s5 = inlined_call_operand.hbm [shape: f32[128,128], index: 5, kind: input, shape index: {}]   ;;  %s646_s6 = inlined_call_operand.vmem [shape: f32[1,128], index: 6, kind: input, shape index: {}]   ;;  %s647_s7 = inlined_call_operand.vmem [shape: f32[8,128], index: 7, kind: output, shape index: {}]  }
   0x1   :  { %s20_s26 = sshll.u32 %s641_s1, 4  ;;  %s21_s26 = int_to_ptr.hbm [resolvable:$true] %s20_s26 }
   0x2   :  { %13 = vsyncpa [#allocation5], 0  ;;  %s506_s27 = smov [#allocation2]   ;;  %s39_s8 = sshll.u32 %s645_s5, 4  ;;  %s40_s8 = int_to_ptr.hbm [resolvable:$true] %s39_s8 }
   0x3   :  { %s22_s28 = sshll.u32 %s506_s27, 4  ;;  %s507_s9 = smov 128   ;;  %s23_s28 = int_to_ptr.vmem [resolvable:$true] %s22_s28 }
   0x4   :  { %s508_s10 = smov 8   ;;  %s509_s11 = smov [#allocation4]  }
   0x5   :  { %28 = dma.hbm_to_vmem [thread:$0]  %s21_s26, 16384, %s23_s28, [#allocation3], %s507_s9, %s507_s9, %s508_s10  }
   0x6   :  { %s41_s12 = sshll.u32 %s509_s11, 4  ;;  %s42_s12 = int_to_ptr.vmem [resolvable:$true] %s41_s12 }
   0x7   :  { %47 = dma.hbm_to_vmem [thread:$0]  %s40_s8, 2048, %s42_s12, [#allocation5], %s507_s9, %s507_s9, %s508_s10  }
   0x8   :  { %502 = dma.done.wait [#allocation3], 16384  }
   0x9   :  { %503 = vsyncadd [#allocation3], 4294950912 }
   0xa   :  { %504 = dma.done.wait [#allocation5], 2048  }
   0xb   :  { %505 = vsyncadd [#allocation5], 4294965248  ;;  %v113_v0 = vld [vmem:[#allocation2 + $0x178] sm:$0xff]  ;;  %v112_v2 = vld [vmem:[#allocation2 + $0x170] sm:$0xff] }
   0xc   :  { %v81_v1 = vld [vmem:[#allocation2 + $0x78] sm:$0xff]  ;;  %238 = vmatpush.msra.mxu2 %v113_v0  ;;  %v80_v4 = vld [vmem:[#allocation2 + $0x70] sm:$0xff]  ;;  %v111_v6 = vld [vmem:[#allocation2 + $0x168] sm:$0xff] }
   0xd   :  { %198 = vmatpush.msra.mxu0 %v81_v1  ;;  %v129_v3 = vld [vmem:[#allocation2 + $0x1f8] sm:$0xff]  ;;  %v128_v7 = vld [vmem:[#allocation2 + $0x1f0] sm:$0xff]  ;;  %v79_v8 = vld [vmem:[#allocation2 + $0x68] sm:$0xff] }
   0xe   :  { %v97_v5 = vld [vmem:[#allocation2 + $0xf8] sm:$0xff]  ;;  %258 = vmatpush.msra.mxu3 %v129_v3  ;;  %239 = vmatpush.msra.mxu2 %v112_v2  ;;  %v96_v9 = vld [vmem:[#allocation2 + $0xf0] sm:$0xff]  ;;  %v127_v10 = vld [vmem:[#allocation2 + $0x1e8] sm:$0xff] }
   0xf   :  { %218 = vmatpush.msra.mxu1 %v97_v5  ;;  %199 = vmatpush.msra.mxu0 %v80_v4  ;;  %v110_v11 = vld [vmem:[#allocation2 + $0x160] sm:$0xff]  ;;  %v95_v13 = vld [vmem:[#allocation2 + $0xe8] sm:$0xff]  ;;  %v109_v16 = vld [vmem:[#allocation2 + $0x158] sm:$0xff] }
  0x10   :  { %259 = vmatpush.msra.mxu3 %v128_v7  ;;  %v78_v12 = vld [vmem:[#allocation2 + $0x60] sm:$0xff]  ;;  %240 = vmatpush.msra.mxu2 %v111_v6  ;;  %v77_v17 = vld [vmem:[#allocation2 + $0x58] sm:$0xff]  ;;  %v108_v20 = vld [vmem:[#allocation2 + $0x150] sm:$0xff] }
  0x11   :  { %219 = vmatpush.msra.mxu1 %v96_v9  ;;  %200 = vmatpush.msra.mxu0 %v79_v8  ;;  %v126_v14 = vld [vmem:[#allocation2 + $0x1e0] sm:$0xff]  ;;  %v125_v18 = vld [vmem:[#allocation2 + $0x1d8] sm:$0xff]  ;;  %v76_v21 = vld [vmem:[#allocation2 + $0x50] sm:$0xff] }
  0x12   :  { %v94_v15 = vld [vmem:[#allocation2 + $0xe0] sm:$0xff]  ;;  %260 = vmatpush.msra.mxu3 %v127_v10  ;;  %241 = vmatpush.msra.mxu2 %v110_v11  ;;  %v93_v19 = vld [vmem:[#allocation2 + $0xd8] sm:$0xff]  ;;  %v124_v22 = vld [vmem:[#allocation2 + $0x1d0] sm:$0xff] }
  0x13   :  { %220 = vmatpush.msra.mxu1 %v95_v13  ;;  %201 = vmatpush.msra.mxu0 %v78_v12  ;;  %v92_v23 = vld [vmem:[#allocation2 + $0xd0] sm:$0xff]  ;;  %v107_v24 = vld [vmem:[#allocation2 + $0x148] sm:$0xff]  ;;  %v106_v28 = vld [vmem:[#allocation2 + $0x140] sm:$0xff] }
  0x14   :  { %261 = vmatpush.msra.mxu3 %v126_v14  ;;  %242 = vmatpush.msra.mxu2 %v109_v16  ;;  %v75_v25 = vld [vmem:[#allocation2 + $0x48] sm:$0xff]  ;;  %v74_v29 = vld [vmem:[#allocation2 + $0x40] sm:$0xff]  ;;  %v105_v32 = vld [vmem:[#allocation2 + $0x138] sm:$0xff] }
  0x15   :  { %221 = vmatpush.msra.mxu1 %v94_v15  ;;  %202 = vmatpush.msra.mxu0 %v77_v17  ;;  %v123_v26 = vld [vmem:[#allocation2 + $0x1c8] sm:$0xff]  ;;  %v122_v30 = vld [vmem:[#allocation2 + $0x1c0] sm:$0xff]  ;;  %v73_v33 = vld [vmem:[#allocation2 + $0x38] sm:$0xff] }
  0x16   :  { %262 = vmatpush.msra.mxu3 %v125_v18  ;;  %243 = vmatpush.msra.mxu2 %v108_v20  ;;  %v91_v27 = vld [vmem:[#allocation2 + $0xc8] sm:$0xff]  ;;  %v90_v31 = vld [vmem:[#allocation2 + $0xc0] sm:$0xff]  ;;  %v121_v34 = vld [vmem:[#allocation2 + $0x1b8] sm:$0xff] }
  0x17   :  { %222 = vmatpush.msra.mxu1 %v93_v19  ;;  %203 = vmatpush.msra.mxu0 %v76_v21  ;;  %v89_v35 = vld [vmem:[#allocation2 + $0xb8] sm:$0xff]  ;;  %v104_v36 = vld [vmem:[#allocation2 + $0x130] sm:$0xff]  ;;  %v103_v40 = vld [vmem:[#allocation2 + $0x128] sm:$0xff] }
  0x18   :  { %263 = vmatpush.msra.mxu3 %v124_v22  ;;  %244 = vmatpush.msra.mxu2 %v107_v24  ;;  %v72_v37 = vld [vmem:[#allocation2 + $0x30] sm:$0xff]  ;;  %v71_v41 = vld [vmem:[#allocation2 + $0x28] sm:$0xff]  ;;  %v102_v44 = vld [vmem:[#allocation2 + $0x120] sm:$0xff] }
  0x19   :  { %223 = vmatpush.msra.mxu1 %v92_v23  ;;  %204 = vmatpush.msra.mxu0 %v75_v25  ;;  %v120_v38 = vld [vmem:[#allocation2 + $0x1b0] sm:$0xff]  ;;  %v119_v42 = vld [vmem:[#allocation2 + $0x1a8] sm:$0xff]  ;;  %v70_v45 = vld [vmem:[#allocation2 + $0x20] sm:$0xff] }
  0x1a   :  { %264 = vmatpush.msra.mxu3 %v123_v26  ;;  %245 = vmatpush.msra.mxu2 %v106_v28  ;;  %v88_v39 = vld [vmem:[#allocation2 + $0xb0] sm:$0xff]  ;;  %v87_v43 = vld [vmem:[#allocation2 + $0xa8] sm:$0xff]  ;;  %v118_v46 = vld [vmem:[#allocation2 + $0x1a0] sm:$0xff] }
  0x1b   :  { %224 = vmatpush.msra.mxu1 %v91_v27  ;;  %205 = vmatpush.msra.mxu0 %v74_v29  ;;  %v86_v47 = vld [vmem:[#allocation2 + $0xa0] sm:$0xff]  ;;  %v101_v48 = vld [vmem:[#allocation2 + $0x118] sm:$0xff]  ;;  %v100_v52 = vld [vmem:[#allocation2 + $0x110] sm:$0xff] }
  0x1c   :  { %265 = vmatpush.msra.mxu3 %v122_v30  ;;  %246 = vmatpush.msra.mxu2 %v105_v32  ;;  %v69_v49 = vld [vmem:[#allocation2 + $0x18] sm:$0xff]  ;;  %v68_v53 = vld [vmem:[#allocation2 + $0x10] sm:$0xff]  ;;  %v99_v56 = vld [vmem:[#allocation2 + $0x108] sm:$0xff] }
  0x1d   :  { %225 = vmatpush.msra.mxu1 %v90_v31  ;;  %206 = vmatpush.msra.mxu0 %v73_v33  ;;  %v117_v50 = vld [vmem:[#allocation2 + $0x198] sm:$0xff]  ;;  %v116_v54 = vld [vmem:[#allocation2 + $0x190] sm:$0xff]  ;;  %v67_v57 = vld [vmem:[#allocation2 + $0x8] sm:$0xff] }
  0x1e   :  { %266 = vmatpush.msra.mxu3 %v121_v34  ;;  %247 = vmatpush.msra.mxu2 %v104_v36  ;;  %v85_v51 = vld [vmem:[#allocation2 + $0x98] sm:$0xff]  ;;  %v84_v55 = vld [vmem:[#allocation2 + $0x90] sm:$0xff]  ;;  %v115_v58 = vld [vmem:[#allocation2 + $0x188] sm:$0xff] }
  0x1f   :  { %226 = vmatpush.msra.mxu1 %v89_v35  ;;  %207 = vmatpush.msra.mxu0 %v72_v37  ;;  %v83_v59 = vld [vmem:[#allocation2 + $0x88] sm:$0xff]  ;;  %v98_v60 = vld [vmem:[#allocation2 + $0x100] sm:$0xff]  ;;  %v177_v62 = vld [vmem:[#allocation2 + $0x378] sm:$0xff] }
  0x20   :  { %267 = vmatpush.msra.mxu3 %v120_v38  ;;  %248 = vmatpush.msra.mxu2 %v103_v40  ;;  %v66_v61 = vld [vmem:[#allocation2] sm:$0xff]  ;;  %v145_v0 = vld [vmem:[#allocation2 + $0x278] sm:$0xff]  ;;  %v176_v2 = vld [vmem:[#allocation2 + $0x370] sm:$0xff] }
  0x21   :  { %227 = vmatpush.msra.mxu1 %v88_v39  ;;  %208 = vmatpush.msra.mxu0 %v71_v41  ;;  %v114_v63 = vld [vmem:[#allocation2 + $0x180] sm:$0xff]  ;;  %v193_v1 = vld [vmem:[#allocation2 + $0x3f8] sm:$0xff]  ;;  %v144_v4 = vld [vmem:[#allocation2 + $0x270] sm:$0xff] }
  0x22   :  { %268 = vmatpush.msra.mxu3 %v119_v42  ;;  %249 = vmatpush.msra.mxu2 %v102_v44  ;;  %v82_v3 = vld [vmem:[#allocation2 + $0x80] sm:$0xff]  ;;  %v161_v5 = vld [vmem:[#allocation2 + $0x2f8] sm:$0xff]  ;;  %v175_v6 = vld [vmem:[#allocation2 + $0x368] sm:$0xff] }
  0x23   :  { %228 = vmatpush.msra.mxu1 %v87_v43  ;;  %209 = vmatpush.msra.mxu0 %v70_v45  ;;  %v192_v7 = vld [vmem:[#allocation2 + $0x3f0] sm:$0xff]  ;;  %v143_v8 = vld [vmem:[#allocation2 + $0x268] sm:$0xff]  ;;  %v174_v10 = vld [vmem:[#allocation2 + $0x360] sm:$0xff] }
  0x24   :  { %269 = vmatpush.msra.mxu3 %v118_v46  ;;  %250 = vmatpush.msra.mxu2 %v101_v48  ;;  %v160_v9 = vld [vmem:[#allocation2 + $0x2f0] sm:$0xff]  ;;  %v191_v11 = vld [vmem:[#allocation2 + $0x3e8] sm:$0xff]  ;;  %v142_v12 = vld [vmem:[#allocation2 + $0x260] sm:$0xff] }
  0x25   :  { %229 = vmatpush.msra.mxu1 %v86_v47  ;;  %210 = vmatpush.msra.mxu0 %v69_v49  ;;  %v159_v13 = vld [vmem:[#allocation2 + $0x2e8] sm:$0xff]  ;;  %v173_v14 = vld [vmem:[#allocation2 + $0x358] sm:$0xff]  ;;  %v190_v15 = vld [vmem:[#allocation2 + $0x3e0] sm:$0xff] }
  0x26   :  { %270 = vmatpush.msra.mxu3 %v117_v50  ;;  %251 = vmatpush.msra.mxu2 %v100_v52  ;;  %v141_v16 = vld [vmem:[#allocation2 + $0x258] sm:$0xff]  ;;  %v158_v17 = vld [vmem:[#allocation2 + $0x2e0] sm:$0xff]  ;;  %v172_v18 = vld [vmem:[#allocation2 + $0x350] sm:$0xff] }
  0x27   :  { %230 = vmatpush.msra.mxu1 %v85_v51  ;;  %211 = vmatpush.msra.mxu0 %v68_v53  ;;  %v189_v19 = vld [vmem:[#allocation2 + $0x3d8] sm:$0xff]  ;;  %v140_v20 = vld [vmem:[#allocation2 + $0x250] sm:$0xff]  ;;  %v171_v22 = vld [vmem:[#allocation2 + $0x348] sm:$0xff] }
  0x28   :  { %271 = vmatpush.msra.mxu3 %v116_v54  ;;  %252 = vmatpush.msra.mxu2 %v99_v56  ;;  %v157_v21 = vld [vmem:[#allocation2 + $0x2d8] sm:$0xff]  ;;  %v188_v23 = vld [vmem:[#allocation2 + $0x3d0] sm:$0xff]  ;;  %v139_v24 = vld [vmem:[#allocation2 + $0x248] sm:$0xff] }
  0x29   :  { %231 = vmatpush.msra.mxu1 %v84_v55  ;;  %212 = vmatpush.msra.mxu0 %v67_v57  ;;  %v156_v25 = vld [vmem:[#allocation2 + $0x2d0] sm:$0xff]  ;;  %v170_v26 = vld [vmem:[#allocation2 + $0x340] sm:$0xff]  ;;  %v187_v27 = vld [vmem:[#allocation2 + $0x3c8] sm:$0xff] }
  0x2a   :  { %272 = vmatpush.msra.mxu3 %v115_v58  ;;  %253 = vmatpush.msra.mxu2 %v98_v60  ;;  %v138_v28 = vld [vmem:[#allocation2 + $0x240] sm:$0xff]  ;;  %v155_v29 = vld [vmem:[#allocation2 + $0x2c8] sm:$0xff]  ;;  %v169_v30 = vld [vmem:[#allocation2 + $0x338] sm:$0xff] }
  0x2b   :  { %232 = vmatpush.msra.mxu1 %v83_v59  ;;  %213 = vmatpush.msra.mxu0 %v66_v61  ;;  %v186_v31 = vld [vmem:[#allocation2 + $0x3c0] sm:$0xff]  ;;  %v137_v32 = vld [vmem:[#allocation2 + $0x238] sm:$0xff]  ;;  %v168_v34 = vld [vmem:[#allocation2 + $0x330] sm:$0xff] }
  0x2c   :  { %318 = vmatpush.msrb.mxu2 %v177_v62  ;;  %273 = vmatpush.msra.mxu3 %v114_v63  ;;  %v154_v33 = vld [vmem:[#allocation2 + $0x2c0] sm:$0xff]  ;;  %v185_v35 = vld [vmem:[#allocation2 + $0x3b8] sm:$0xff]  ;;  %v136_v36 = vld [vmem:[#allocation2 + $0x230] sm:$0xff] }
  0x2d   :  { %278 = vmatpush.msrb.mxu0 %v145_v0  ;;  %233 = vmatpush.msra.mxu1 %v82_v3  ;;  %v153_v37 = vld [vmem:[#allocation2 + $0x2b8] sm:$0xff]  ;;  %v167_v38 = vld [vmem:[#allocation2 + $0x328] sm:$0xff]  ;;  %v184_v39 = vld [vmem:[#allocation2 + $0x3b0] sm:$0xff] }
  0x2e   :  { %338 = vmatpush.msrb.mxu3 %v193_v1  ;;  %319 = vmatpush.msrb.mxu2 %v176_v2  ;;  %v135_v40 = vld [vmem:[#allocation2 + $0x228] sm:$0xff]  ;;  %v152_v41 = vld [vmem:[#allocation2 + $0x2b0] sm:$0xff]  ;;  %v166_v42 = vld [vmem:[#allocation2 + $0x320] sm:$0xff] }
  0x2f   :  { %279 = vmatpush.msrb.mxu0 %v144_v4  ;;  %298 = vmatpush.msrb.mxu1 %v161_v5  ;;  %v183_v43 = vld [vmem:[#allocation2 + $0x3a8] sm:$0xff]  ;;  %v60_v44 = vld [vmem:[%s640_s0 + $0x10] sm:$0xff]  ;;  %v134_v45 = vld [vmem:[#allocation2 + $0x220] sm:$0xff] }
  0x30   :  { %320 = vmatpush.msrb.mxu2 %v175_v6  ;;  %339 = vmatpush.msrb.mxu3 %v192_v7  ;;  %v151_v46 = vld [vmem:[#allocation2 + $0x2a8] sm:$0xff]  ;;  %v165_v47 = vld [vmem:[#allocation2 + $0x318] sm:$0xff]  ;;  %v182_v48 = vld [vmem:[#allocation2 + $0x3a0] sm:$0xff] }
  0x31   :  { %280 = vmatpush.msrb.mxu0 %v143_v8  ;;  %299 = vmatpush.msrb.mxu1 %v160_v9  ;;  %v58_v49 = vld [vmem:[%s640_s0] sm:$0xff]  ;;  %v61_v50 = vld [vmem:[%s640_s0 + $0x18] sm:$0xff]  ;;  %v164_v53 = vld [vmem:[#allocation2 + $0x310] sm:$0xff] }
  0x32   :  { %321 = vmatpush.msrb.mxu2 %v174_v10  ;;  %340 = vmatpush.msrb.mxu3 %v191_v11  ;;  %v133_v51 = vld [vmem:[#allocation2 + $0x218] sm:$0xff]  ;;  %v150_v52 = vld [vmem:[#allocation2 + $0x2a0] sm:$0xff]  ;;  %v59_v55 = vld [vmem:[%s640_s0 + $0x8] sm:$0xff] }
  0x33   :  { %281 = vmatpush.msrb.mxu0 %v142_v12  ;;  %300 = vmatpush.msrb.mxu1 %v159_v13  ;;  %v181_v54 = vld [vmem:[#allocation2 + $0x398] sm:$0xff]  ;;  %v132_v56 = vld [vmem:[#allocation2 + $0x210] sm:$0xff]  ;;  %v163_v58 = vld [vmem:[#allocation2 + $0x308] sm:$0xff] }
  0x34   :  { %322 = vmatpush.msrb.mxu2 %v173_v14  ;;  %341 = vmatpush.msrb.mxu3 %v190_v15  ;;  %v149_v57 = vld [vmem:[#allocation2 + $0x298] sm:$0xff]  ;;  %v180_v59 = vld [vmem:[#allocation2 + $0x390] sm:$0xff]  ;;  %v131_v60 = vld [vmem:[#allocation2 + $0x208] sm:$0xff] }
  0x35   :  { %282 = vmatpush.msrb.mxu0 %v141_v16  ;;  %301 = vmatpush.msrb.mxu1 %v158_v17  ;;  %v148_v61 = vld [vmem:[#allocation2 + $0x290] sm:$0xff]  ;;  %v162_v62 = vld [vmem:[#allocation2 + $0x300] sm:$0xff]  ;;  %v179_v63 = vld [vmem:[#allocation2 + $0x388] sm:$0xff] }
  0x36   :  { %323 = vmatpush.msrb.mxu2 %v172_v18  ;;  %342 = vmatpush.msrb.mxu3 %v189_v19  ;;  %v64_v0 = vld [vmem:[%s640_s0 + $0x30] sm:$0xff]  ;;  %v130_v1 = vld [vmem:[#allocation2 + $0x200] sm:$0xff]  ;;  %v147_v2 = vld [vmem:[#allocation2 + $0x288] sm:$0xff] }
  0x37   :  { %283 = vmatpush.msrb.mxu0 %v140_v20  ;;  %302 = vmatpush.msrb.mxu1 %v157_v21  ;;  %v178_v3 = vld [vmem:[#allocation2 + $0x380] sm:$0xff]  ;;  %v65_v5 = vld [vmem:[%s640_s0 + $0x38] sm:$0xff]  ;;  %v63_v8 = vld [vmem:[%s640_s0 + $0x28] sm:$0xff] }
  0x38   :  { %324 = vmatpush.msrb.mxu2 %v171_v22  ;;  %343 = vmatpush.msrb.mxu3 %v188_v23  ;;  %v62_v4 = vld [vmem:[%s640_s0 + $0x20] sm:$0xff]  ;;  %v374_v7 = vld [vmem:[%s643_s3 + $0x78] sm:$0xff]  ;;  %v373_v9 = vld [vmem:[%s643_s3 + $0x70] sm:$0xff] }
  0x39   :  { %284 = vmatpush.msrb.mxu0 %v139_v24  ;;  %303 = vmatpush.msrb.mxu1 %v156_v25  ;;  %v146_v6 = vld [vmem:[#allocation2 + $0x280] sm:$0xff]  ;;  %v372_v10 = vld [vmem:[%s643_s3 + $0x68] sm:$0xff]  ;;  %v370_v12 = vld [vmem:[%s643_s3 + $0x58] sm:$0xff] }
  0x3a   :  { %325 = vmatpush.msrb.mxu2 %v170_v26  ;;  %344 = vmatpush.msrb.mxu3 %v187_v27  ;;  %v371_v11 = vld [vmem:[%s643_s3 + $0x60] sm:$0xff]  ;;  %v369_v13 = vld [vmem:[%s643_s3 + $0x50] sm:$0xff]  ;;  %v368_v14 = vld [vmem:[%s643_s3 + $0x48] sm:$0xff] }
  0x3b   :  { %285 = vmatpush.msrb.mxu0 %v138_v28  ;;  %304 = vmatpush.msrb.mxu1 %v155_v29  ;;  %v367_v15 = vld [vmem:[%s643_s3 + $0x40] sm:$0xff]  ;;  %v366_v16 = vld [vmem:[%s643_s3 + $0x38] sm:$0xff]  ;;  %v365_v17 = vld [vmem:[%s643_s3 + $0x30] sm:$0xff] }
  0x3c   :  { %326 = vmatpush.msrb.mxu2 %v169_v30  ;;  %345 = vmatpush.msrb.mxu3 %v186_v31  ;;  %v364_v18 = vld [vmem:[%s643_s3 + $0x28] sm:$0xff]  ;;  %v363_v19 = vld [vmem:[%s643_s3 + $0x20] sm:$0xff]  ;;  %v362_v20 = vld [vmem:[%s643_s3 + $0x18] sm:$0xff] }
  0x3d   :  { %286 = vmatpush.msrb.mxu0 %v137_v32  ;;  %305 = vmatpush.msrb.mxu1 %v154_v33  ;;  %v361_v21 = vld [vmem:[%s643_s3 + $0x10] sm:$0xff]  ;;  %v360_v22 = vld [vmem:[%s643_s3 + $0x8] sm:$0xff]  ;;  %v359_v23 = vld [vmem:[%s643_s3] sm:$0xff] }
  0x3e   :  { %327 = vmatpush.msrb.mxu2 %v168_v34  ;;  %346 = vmatpush.msrb.mxu3 %v185_v35  ;;  %v415_v24 = vld [vmem:[#allocation4 + $0x78] sm:$0xff]  ;;  %v414_v25 = vld [vmem:[#allocation4 + $0x70] sm:$0xff]  ;;  %v413_v26 = vld [vmem:[#allocation4 + $0x68] sm:$0xff] }
  0x3f   :  { %287 = vmatpush.msrb.mxu0 %v136_v36  ;;  %306 = vmatpush.msrb.mxu1 %v153_v37  ;;  %v412_v27 = vld [vmem:[#allocation4 + $0x60] sm:$0xff]  ;;  %v411_v28 = vld [vmem:[#allocation4 + $0x58] sm:$0xff]  ;;  %v410_v30 = vld [vmem:[#allocation4 + $0x50] sm:$0xff] }
  0x40   :  { %328 = vmatpush.msrb.mxu2 %v167_v38  ;;  %347 = vmatpush.msrb.mxu3 %v184_v39  ;;  %v451_v29 = vld [vmem:[%s642_s2] ss:$0 sm:$0xff]  ;;  %v409_v31 = vld [vmem:[#allocation4 + $0x48] sm:$0xff]  ;;  %v407_v36 = vld [vmem:[#allocation4 + $0x38] sm:$0xff] }
  0x41   :  { %288 = vmatpush.msrb.mxu0 %v135_v40  ;;  %307 = vmatpush.msrb.mxu1 %v152_v41  ;;  %v408_v34 = vld [vmem:[#allocation4 + $0x40] sm:$0xff]  ;;  %v406_v39 = vld [vmem:[#allocation4 + $0x30] sm:$0xff] }
  0x42   :  { %329 = vmatpush.msrb.mxu2 %v166_v42  ;;  %348 = vmatpush.msrb.mxu3 %v183_v43  ;;  %v405_v42 = vld [vmem:[#allocation4 + $0x28] sm:$0xff] }
  0x43   :  { %254 = vmatmul.f32.vlgmr.msra.gmra.mxu2 %v60_v44  ;;  %289 = vmatpush.msrb.mxu0 %v134_v45  ;;  %v404_v44 = vld [vmem:[#allocation4 + $0x20] sm:$0xff] }
  0x44   :  { %308 = vmatpush.msrb.mxu1 %v151_v46  ;;  %330 = vmatpush.msrb.mxu2 %v165_v47  ;;  %v403_v47 = vld [vmem:[#allocation4 + $0x18] sm:$0xff] }
  0x45   :  { %349 = vmatpush.msrb.mxu3 %v182_v48  ;;  %214 = vmatmul.f32.vlgmr.msra.gmra.mxu0 %v58_v49 }
  0x46   :  { %274 = vmatmul.f32.vlgmr.msra.gmra.mxu3 %v61_v50  ;;  %290 = vmatpush.msrb.mxu0 %v133_v51 }
  0x47   :  { %309 = vmatpush.msrb.mxu1 %v150_v52  ;;  %331 = vmatpush.msrb.mxu2 %v164_v53 }
  0x48   :  { %350 = vmatpush.msrb.mxu3 %v181_v54  ;;  %234 = vmatmul.f32.vlgmr.msra.gmra.mxu1 %v59_v55  ;;  %v402_v55 = vld [vmem:[#allocation4 + $0x10] sm:$0xff] }
  0x49   :  { %291 = vmatpush.msrb.mxu0 %v132_v56  ;;  %310 = vmatpush.msrb.mxu1 %v149_v57  ;;  %v401_v56 = vld [vmem:[#allocation4 + $0x8] sm:$0xff]  ;;  %v400_v57 = vld [vmem:[#allocation4] sm:$0xff] }
  0x4a   :  { %332 = vmatpush.msrb.mxu2 %v163_v58  ;;  %351 = vmatpush.msrb.mxu3 %v180_v59  ;;  %v452_v58 = vld [vmem:[%s644_s4] ss:$0 sm:$0xff] }
  0x4b   :  { %292 = vmatpush.msrb.mxu0 %v131_v60  ;;  %311 = vmatpush.msrb.mxu1 %v148_v61 }
  0x4c   :  { %333 = vmatpush.msrb.mxu2 %v162_v62  ;;  %352 = vmatpush.msrb.mxu3 %v179_v63  ;;  %v453_v62 = vld [vmem:[%s646_s6] ss:$0 sm:$0xff] }
  0x4d   :  { %334 = vmatmul.f32.vlgmr.msrb.gmra.mxu2 %v64_v0  ;;  %293 = vmatpush.msrb.mxu0 %v130_v1 }
  0x4e   :  { %312 = vmatpush.msrb.mxu1 %v147_v2  ;;  %353 = vmatpush.msrb.mxu3 %v178_v3 }
  0x4f   :  { %294 = vmatmul.f32.vlgmr.msrb.gmra.mxu0 %v62_v4  ;;  %354 = vmatmul.f32.vlgmr.msrb.gmra.mxu3 %v65_v5 }
  0x50   :  { %313 = vmatpush.msrb.mxu1 %v146_v6  ;;  %379 = vmatpush.msra.mxu0 %v374_v7 }
  0x51   :  { %314 = vmatmul.f32.vlgmr.msrb.gmra.mxu1 %v63_v8 }
  0x52   :  { %380 = vmatpush.msra.mxu0 %v373_v9  ;;  %420 = vmatpush.msra.mxu1 %v415_v24 }
  0x54   :  { %381 = vmatpush.msra.mxu0 %v372_v10  ;;  %421 = vmatpush.msra.mxu1 %v414_v25 }
  0x56   :  { %382 = vmatpush.msra.mxu0 %v371_v11  ;;  %422 = vmatpush.msra.mxu1 %v413_v26 }
  0x58   :  { %383 = vmatpush.msra.mxu0 %v370_v12  ;;  %423 = vmatpush.msra.mxu1 %v412_v27 }
  0x5a   :  { %384 = vmatpush.msra.mxu0 %v369_v13  ;;  %424 = vmatpush.msra.mxu1 %v411_v28 }
  0x5c   :  { %385 = vmatpush.msra.mxu0 %v368_v14  ;;  %425 = vmatpush.msra.mxu1 %v410_v30 }
  0x5e   :  { %386 = vmatpush.msra.mxu0 %v367_v15  ;;  %426 = vmatpush.msra.mxu1 %v409_v31 }
  0x60   :  { %387 = vmatpush.msra.mxu0 %v366_v16  ;;  %427 = vmatpush.msra.mxu1 %v408_v34 }
  0x62   :  { %388 = vmatpush.msra.mxu0 %v365_v17  ;;  %428 = vmatpush.msra.mxu1 %v407_v36 }
  0x64   :  { %389 = vmatpush.msra.mxu0 %v364_v18  ;;  %429 = vmatpush.msra.mxu1 %v406_v39 }
  0x66   :  { %390 = vmatpush.msra.mxu0 %v363_v19  ;;  %430 = vmatpush.msra.mxu1 %v405_v42 }
  0x68   :  { %391 = vmatpush.msra.mxu0 %v362_v20  ;;  %431 = vmatpush.msra.mxu1 %v404_v44 }
  0x6a   :  { %392 = vmatpush.msra.mxu0 %v361_v21  ;;  %432 = vmatpush.msra.mxu1 %v403_v47 }
  0x6c   :  { %393 = vmatpush.msra.mxu0 %v360_v22  ;;  %433 = vmatpush.msra.mxu1 %v402_v55 }
  0x6e   :  { %394 = vmatpush.msra.mxu0 %v359_v23  ;;  %434 = vmatpush.msra.mxu1 %v401_v56 }
  0x70   :  { %435 = vmatpush.msra.mxu1 %v400_v57 }
  0xc2   :  { %v215_v32 = vpop.f32.mrf.mxu0 }
  0xc3   :  { %v216_v33 = vadd.f32 %v451_v29, %v215_v32 }
  0xc5   :  { %v235_v35 = vpop.f32.mrf.mxu1 }
  0xc6   :  { %v236_v37 = vadd.f32 %v235_v35, %v216_v33  ;;  %v255_v38 = vpop.f32.mrf.mxu2 }
  0xc8   :  { %v256_v40 = vadd.f32 %v255_v38, %v236_v37 }
  0xc9   :  { %v275_v41 = vpop.f32.mrf.mxu3 }
  0xca   :  { %v276_v43 = vadd.f32 %v275_v41, %v256_v40 }
  0xcc   :  { %v295_v45 = vpop.f32.mrf.mxu0 }
  0xcd   :  { %v296_v46 = vadd.f32 %v295_v45, %v276_v43 }
  0xce   :  { %v315_v48 = vpop.f32.mrf.mxu1 }
  0xcf   :  { %v316_v49 = vadd.f32 %v315_v48, %v296_v46 }
  0xd0   :  { %v335_v50 = vpop.f32.mrf.mxu2 }
  0xd1   :  { %v336_v51 = vadd.f32 %v335_v50, %v316_v49 }
  0xd2   :  { %v355_v52 = vpop.f32.mrf.mxu3 }
  0xd3   :  { %v356_v53 = vadd.f32 %v355_v52, %v336_v51 }
  0xd5   :  { %v358_v54 = vmax.f32 %v356_v53, 0.0 }
  0xd7   :  { %395 = vmatmul.f32.vlgmr.msra.gmra.mxu0 %v358_v54 }
 0x154   :  { %v396_v59 = vpop.f32.mrf.mxu0 }
 0x155   :  { %v397_v60 = vadd.f32 %v452_v58, %v396_v59 }
 0x157   :  { %v399_v61 = vmax.f32 %v397_v60, 0.0 }
 0x159   :  { %436 = vmatmul.f32.vlgmr.msra.gmra.mxu1 %v399_v61 }
 0x1d6   :  { %v437_v63 = vpop.f32.mrf.mxu1 }
 0x1d7   :  { %v438_v0 = vadd.f32 %v453_v62, %v437_v63 }
 0x1d9   :  { %440 = vst [vmem:[%s647_s7] sm:$0xff] %v438_v0 }
 0x1da   :  { %445 = vsyncpa [#allocation3], 1 }
 0x1db   :  { %446 = vsyncpa [#allocation5], 1 }

</bundles_post_ra>
